<compile_context>
chip_gen: v5e
topology: v5e:2x2
jax: 0.10.0
libtpu: 0.0.40
codegen_flags: <defaults>
</compile_context>

<pallas_src>
import jax
import jax.numpy as jnp
from jax.experimental import pallas as pl
from jax.experimental.pallas import tpu as pltpu


def make_rnn_kernel(seq_len, batch, hidden):
    def rnn_kernel(x_ref, wih_t_ref, whh_t_ref, bias_ref, out_ref):
        # x_ref:     (seq*batch, input)   VMEM
        # wih_t_ref: (input, hidden)      VMEM   (W_ih^T, pre-transposed in wrapper)
        # whh_t_ref: (hidden, hidden)     VMEM   (W_hh^T, pre-transposed in wrapper)
        # bias_ref:  (1, hidden)          VMEM   (b_ih + b_hh, folded in wrapper)
        # out_ref:   (seq*batch, hidden)  VMEM

        # 1) Input projection + bias: one large MXU matmul, off the serial chain.
        pre_x = (
            jnp.dot(x_ref[...], wih_t_ref[...], preferred_element_type=jnp.float32)
            + bias_ref[...]
        )  # (seq*batch, hidden) f32

        whh_t = whh_t_ref[...]  # (hidden, hidden), consumed directly by the MXU

        # 2) Recurrence: fully unrolled (seq_len is small & static), one matmul/step.
        h = jnp.zeros((batch, hidden), jnp.float32)
        hs = []
        for t in range(seq_len):
            pre = pre_x[t * batch:(t + 1) * batch, :]  # static slice
            h = jnp.tanh(
                pre + jnp.dot(h, whh_t, preferred_element_type=jnp.float32)
            )
            hs.append(h)

        # 3) Single lane-dense bulk store of the whole output slab.
        out_ref[...] = jnp.concatenate(hs, axis=0).astype(out_ref.dtype)

    return rnn_kernel


def rnn_forward(x, w_ih, w_hh, b_ih, b_hh):
    """x: (seq, batch, input) f32 -> out: (seq*batch, hidden) f32 (== torch out.reshape(-1, H))."""
    seq_len, batch, input_size = x.shape
    hidden = w_ih.shape[0]

    # Free layout plumbing outside the kernel (no XLU transposes inside the kernel).
    x_flat = x.reshape(seq_len * batch, input_size)
    wih_t = jnp.transpose(w_ih)               # (input, hidden)
    whh_t = jnp.transpose(w_hh)               # (hidden, hidden)
    bias = (b_ih + b_hh).reshape(1, hidden)   # fold the two biases once

    out = pl.pallas_call(
        make_rnn_kernel(seq_len, batch, hidden),
        out_shape=jax.ShapeDtypeStruct((seq_len * batch, hidden), jnp.float32),
        in_specs=[
            pl.BlockSpec(memory_space=pltpu.MemorySpace.VMEM),  # x_flat
            pl.BlockSpec(memory_space=pltpu.MemorySpace.VMEM),  # W_ih^T
            pl.BlockSpec(memory_space=pltpu.MemorySpace.VMEM),  # W_hh^T
            pl.BlockSpec(memory_space=pltpu.MemorySpace.VMEM),  # bias
        ],
        out_specs=pl.BlockSpec(memory_space=pltpu.MemorySpace.VMEM),
        compiler_params=pltpu.CompilerParams(vmem_limit_bytes=64 * 1024 * 1024),
    )(x_flat, wih_t, whh_t, bias)

    return out


def rnn_reference(x, w_ih, w_hh, b_ih, b_hh):
    """Pure-JAX reference (mirrors torch.nn.RNN forward with h_0 = 0)."""
    seq_len, batch, _ = x.shape
    hidden = w_ih.shape[0]
    h = jnp.zeros((batch, hidden), jnp.float32)
    outs = []
    for t in range(seq_len):
        h = jnp.tanh(x[t] @ w_ih.T + b_ih + h @ w_hh.T + b_hh)
        outs.append(h)
    return jnp.stack(outs).reshape(-1, hidden)


if __name__ == "__main__":
    # Module hyperparameters (from the PyTorch script)
    batch_size = 1
    hidden_size = 4
    input_size = 4
    num_layer = 1   # single-layer RNN implemented
    seq_len = 8

    key = jax.random.PRNGKey(0)
    k_x, k_wih, k_whh, k_bih, k_bhh = jax.random.split(key, 5)

    # Deterministic parameter init (uniform in [-1/sqrt(H), 1/sqrt(H)], like torch)
    bound = 1.0 / (hidden_size ** 0.5)
    w_ih = jax.random.uniform(k_wih, (hidden_size, input_size), jnp.float32, -bound, bound)
    w_hh = jax.random.uniform(k_whh, (hidden_size, hidden_size), jnp.float32, -bound, bound)
    b_ih = jax.random.uniform(k_bih, (hidden_size,), jnp.float32, -bound, bound)
    b_hh = jax.random.uniform(k_bhh, (hidden_size,), jnp.float32, -bound, bound)

    x = jax.random.normal(k_x, (seq_len, batch_size, input_size), jnp.float32)

    out = rnn_forward(x, w_ih, w_hh, b_ih, b_hh)
    out = jax.block_until_ready(out)

    ref = rnn_reference(x, w_ih, w_hh, b_ih, b_hh)
    assert out.shape == (seq_len * batch_size, hidden_size)
    assert jnp.allclose(out, ref, atol=1e-5, rtol=1e-5)

    print("KERNEL_OK")
</pallas_src>

<mosaic_0001>
module attributes {stable_mosaic.version = 11 : i64} {
  func.func @rnn_kernel(%arg0: memref<8x4xf32, #tpu.memory_space<vmem>>, %arg1: memref<4x4xf32, #tpu.memory_space<vmem>>, %arg2: memref<4x4xf32, #tpu.memory_space<vmem>>, %arg3: memref<1x4xf32, #tpu.memory_space<vmem>>, %arg4: memref<8x4xf32, #tpu.memory_space<vmem>>) attributes {dimension_semantics = [], scalar_prefetch = 0 : i64, scratch_operands = 0 : i64, tpu.core_type = #tpu.core_type<tc>} {
    %c0 = arith.constant 0 : index
    %c0_0 = arith.constant 0 : index
    %0 = vector.load %arg0[%c0, %c0_0] : memref<8x4xf32, #tpu.memory_space<vmem>>, vector<8x4xf32>
    %c0_1 = arith.constant 0 : index
    %c0_2 = arith.constant 0 : index
    %1 = vector.load %arg1[%c0_1, %c0_2] : memref<4x4xf32, #tpu.memory_space<vmem>>, vector<4x4xf32>
    %cst = arith.constant dense<0.000000e+00> : vector<8x4xf32>
    %2 = tpu.matmul %0, %1, %cst {dimension_numbers = #tpu.dot_dimension_numbers<[1], [0], [0], [1], [0, 0, 1, 1], [], []>} : vector<8x4xf32>, vector<4x4xf32>, vector<8x4xf32> -> vector<8x4xf32>
    %c0_3 = arith.constant 0 : index
    %c0_4 = arith.constant 0 : index
    %3 = vector.load %arg3[%c0_3, %c0_4] : memref<1x4xf32, #tpu.memory_space<vmem>>, vector<1x4xf32>
    %4 = vector.broadcast %3 : vector<1x4xf32> to vector<8x4xf32>
    %5 = arith.addf %2, %4 : vector<8x4xf32>
    %c0_5 = arith.constant 0 : index
    %c0_6 = arith.constant 0 : index
    %6 = vector.load %arg2[%c0_5, %c0_6] : memref<4x4xf32, #tpu.memory_space<vmem>>, vector<4x4xf32>
    %cst_7 = arith.constant 0.000000e+00 : f32
    %7 = vector.broadcast %cst_7 : f32 to vector<1x4xf32>
    %8 = vector.extract_strided_slice %5 {offsets = [0, 0], sizes = [1, 4], strides = [1, 1]} : vector<8x4xf32> to vector<1x4xf32>
    %cst_8 = arith.constant dense<0.000000e+00> : vector<1x4xf32>
    %9 = tpu.matmul %7, %6, %cst_8 {dimension_numbers = #tpu.dot_dimension_numbers<[1], [0], [0], [1], [0, 0, 1, 1], [], []>} : vector<1x4xf32>, vector<4x4xf32>, vector<1x4xf32> -> vector<1x4xf32>
    %10 = arith.addf %8, %9 : vector<1x4xf32>
    %11 = math.tanh %10 : vector<1x4xf32>
    %12 = vector.extract_strided_slice %5 {offsets = [1, 0], sizes = [1, 4], strides = [1, 1]} : vector<8x4xf32> to vector<1x4xf32>
    %cst_9 = arith.constant dense<0.000000e+00> : vector<1x4xf32>
    %13 = tpu.matmul %11, %6, %cst_9 {dimension_numbers = #tpu.dot_dimension_numbers<[1], [0], [0], [1], [0, 0, 1, 1], [], []>} : vector<1x4xf32>, vector<4x4xf32>, vector<1x4xf32> -> vector<1x4xf32>
    %14 = arith.addf %12, %13 : vector<1x4xf32>
    %15 = math.tanh %14 : vector<1x4xf32>
    %16 = vector.extract_strided_slice %5 {offsets = [2, 0], sizes = [1, 4], strides = [1, 1]} : vector<8x4xf32> to vector<1x4xf32>
    %cst_10 = arith.constant dense<0.000000e+00> : vector<1x4xf32>
    %17 = tpu.matmul %15, %6, %cst_10 {dimension_numbers = #tpu.dot_dimension_numbers<[1], [0], [0], [1], [0, 0, 1, 1], [], []>} : vector<1x4xf32>, vector<4x4xf32>, vector<1x4xf32> -> vector<1x4xf32>
    %18 = arith.addf %16, %17 : vector<1x4xf32>
    %19 = math.tanh %18 : vector<1x4xf32>
    %20 = vector.extract_strided_slice %5 {offsets = [3, 0], sizes = [1, 4], strides = [1, 1]} : vector<8x4xf32> to vector<1x4xf32>
    %cst_11 = arith.constant dense<0.000000e+00> : vector<1x4xf32>
    %21 = tpu.matmul %19, %6, %cst_11 {dimension_numbers = #tpu.dot_dimension_numbers<[1], [0], [0], [1], [0, 0, 1, 1], [], []>} : vector<1x4xf32>, vector<4x4xf32>, vector<1x4xf32> -> vector<1x4xf32>
    %22 = arith.addf %20, %21 : vector<1x4xf32>
    %23 = math.tanh %22 : vector<1x4xf32>
    %24 = vector.extract_strided_slice %5 {offsets = [4, 0], sizes = [1, 4], strides = [1, 1]} : vector<8x4xf32> to vector<1x4xf32>
    %cst_12 = arith.constant dense<0.000000e+00> : vector<1x4xf32>
    %25 = tpu.matmul %23, %6, %cst_12 {dimension_numbers = #tpu.dot_dimension_numbers<[1], [0], [0], [1], [0, 0, 1, 1], [], []>} : vector<1x4xf32>, vector<4x4xf32>, vector<1x4xf32> -> vector<1x4xf32>
    %26 = arith.addf %24, %25 : vector<1x4xf32>
    %27 = math.tanh %26 : vector<1x4xf32>
    %28 = vector.extract_strided_slice %5 {offsets = [5, 0], sizes = [1, 4], strides = [1, 1]} : vector<8x4xf32> to vector<1x4xf32>
    %cst_13 = arith.constant dense<0.000000e+00> : vector<1x4xf32>
    %29 = tpu.matmul %27, %6, %cst_13 {dimension_numbers = #tpu.dot_dimension_numbers<[1], [0], [0], [1], [0, 0, 1, 1], [], []>} : vector<1x4xf32>, vector<4x4xf32>, vector<1x4xf32> -> vector<1x4xf32>
    %30 = arith.addf %28, %29 : vector<1x4xf32>
    %31 = math.tanh %30 : vector<1x4xf32>
    %32 = vector.extract_strided_slice %5 {offsets = [6, 0], sizes = [1, 4], strides = [1, 1]} : vector<8x4xf32> to vector<1x4xf32>
    %cst_14 = arith.constant dense<0.000000e+00> : vector<1x4xf32>
    %33 = tpu.matmul %31, %6, %cst_14 {dimension_numbers = #tpu.dot_dimension_numbers<[1], [0], [0], [1], [0, 0, 1, 1], [], []>} : vector<1x4xf32>, vector<4x4xf32>, vector<1x4xf32> -> vector<1x4xf32>
    %34 = arith.addf %32, %33 : vector<1x4xf32>
    %35 = math.tanh %34 : vector<1x4xf32>
    %36 = vector.extract_strided_slice %5 {offsets = [7, 0], sizes = [1, 4], strides = [1, 1]} : vector<8x4xf32> to vector<1x4xf32>
    %cst_15 = arith.constant dense<0.000000e+00> : vector<1x4xf32>
    %37 = tpu.matmul %35, %6, %cst_15 {dimension_numbers = #tpu.dot_dimension_numbers<[1], [0], [0], [1], [0, 0, 1, 1], [], []>} : vector<1x4xf32>, vector<4x4xf32>, vector<1x4xf32> -> vector<1x4xf32>
    %38 = arith.addf %36, %37 : vector<1x4xf32>
    %39 = math.tanh %38 : vector<1x4xf32>
    %40 = tpu.concatenate %11, %15, %19, %23, %27, %31, %35, %39 in 0 : vector<1x4xf32>, vector<1x4xf32>, vector<1x4xf32>, vector<1x4xf32>, vector<1x4xf32>, vector<1x4xf32>, vector<1x4xf32>, vector<1x4xf32> -> vector<8x4xf32>
    %c0_16 = arith.constant 0 : index
    %c0_17 = arith.constant 0 : index
    %41 = vector.load %arg4[%c0_16, %c0_17] : memref<8x4xf32, #tpu.memory_space<vmem>>, vector<8x4xf32>
    tpu.vector_store %arg4[%c0_16, %c0_17], %40 {strides = array<i32>} : memref<8x4xf32, #tpu.memory_space<vmem>>, vector<8x4xf32>,
    return
  }
}

</mosaic_0001>

<bundles_post_ra>
// kernel: tpu_custom_call.1
= control target key start
LH: loop header
LB: loop body
LE: loop exit
PB: predicated region body
PF: predicated region fallthrough
CT: control target
= control target key end

     0   :  { %vm27_vm0 = vcmask 1043456   ;;  %vm23_vm1 = vcmask 31744   ;;  %v335_v3 = vmov 0.0   ;;  %vm282_vm2 = vcmask 1040384   ;;  %s395_s1 = inlined_call_operand.vmem [shape: f32[4,4], index: 1, kind: input, shape index: {}]   ;;  %s396_s0 = inlined_call_operand.vmem [shape: f32[8,4], index: 0, kind: input, shape index: {}]   ;;  %s397_s2 = inlined_call_operand.vmem [shape: f32[4,4], index: 2, kind: input, shape index: {}]   ;;  %s398_s3 = inlined_call_operand.vmem [shape: f32[1,4], index: 3, kind: input, shape index: {}]   ;;  %s399_s4 = inlined_call_operand.vmem [shape: f32[8,4], index: 4, kind: output, shape index: {}]  }
   0x1   :  { %v18_v0 = vld [vmem:[%s395_s1] sm:$0xf]  ;;  %vm284_vm3 = vcmask 1041408   ;;  %vm286_vm4 = vcmask 1042432   ;;  %vm289_vm5 = vcmask 1044480   ;;  %vm291_vm6 = vcmask 1045504  }
   0x2   :  { %v17_v1 = vld [vmem:[%s396_s0] sm:$0xff]  ;;  %300 = vmatpush.msk.msra.mxu0 %vm27_vm0, %v18_v0  ;;  %vm293_vm7 = vcmask 1046528  }
   0x3   :  { %v51_v2 = vld [vmem:[%s397_s2] sm:$0xf]  ;;  %301 = vmatmul.msk.f32.vlgmr.msra.gmra.mxu0 %vm23_vm1, %v17_v1 }
   0x4   :  { %302 = vmatpush.msk.msra.mxu1 %vm27_vm0, %v51_v2  ;;  %303 = vmatpush.msk.msra.mxu2 %vm27_vm0, %v51_v2  ;;  %v318_v4 = vld [vmem:[%s398_s3] ss:$0 sm:$0xff] }
   0x5   :  { %74 = vmatmul.f32.vlgmr.msra.gmra.mxu1 %v335_v3  ;;  %305 = vmatpush.msk.msra.mxu3 %vm27_vm0, %v51_v2 }
   0x6   :  { %307 = vmatpush.msk.msrb.mxu0 %vm27_vm0, %v51_v2  ;;  %309 = vmatpush.msk.msrb.mxu1 %vm27_vm0, %v51_v2 }
   0x7   :  { %311 = vmatpush.msk.msrb.mxu2 %vm27_vm0, %v51_v2  ;;  %313 = vmatpush.msk.msrb.mxu3 %vm27_vm0, %v51_v2 }
   0x8   :  { %315 = vmatpush.msk.msra.mxu0 %vm27_vm0, %v51_v2 }
  0x80   :  { %v48_v5 = vpop.f32.mrf.mxu0 }
  0x81   :  { %v49_v7 = vadd.f32 %v318_v4, %v48_v5 }
  0x82   :  { %v75_v6 = vpop.f32.mrf.mxu1 }
  0x83   :  { %v78_v8 = vadd.f32 %v75_v6, %v49_v7 }
  0x85   :  { %319 = vtanh.f32 %v78_v8 }
  0x8b   :  { %v320_v9 = vpop.eup %319 }
  0x8c   :  { %304 = vmatmul.msk.f32.vlgmr.msra.gmra.mxu2 %vm23_vm1, %v320_v9 }
 0x10f   :  { %v100_v10 = vpop.f32.mrf.mxu2 }
 0x110   :  { %v104_v11 = vrot.slane %v100_v10, 7 }
 0x112   :  { %v106_v12 = vadd.f32 %v104_v11, %v49_v7 }
 0x114   :  { %321 = vtanh.f32 %v106_v12 }
 0x11a   :  { %v322_v13 = vpop.eup %321 }
 0x11b   :  { %v109_v14 = vrot.slane %v322_v13, 1  ;;  %v283_v19 = vsel %vm282_vm2, %v320_v9, %v322_v13 }
 0x11d   :  { %306 = vmatmul.msk.f32.vlgmr.msra.gmra.mxu3 %vm23_vm1, %v109_v14 }
 0x1a0   :  { %v129_v15 = vpop.f32.mrf.mxu3 }
 0x1a1   :  { %v133_v16 = vrot.slane %v129_v15, 6 }
 0x1a3   :  { %v135_v17 = vadd.f32 %v133_v16, %v49_v7 }
 0x1a5   :  { %323 = vtanh.f32 %v135_v17 }
 0x1ab   :  { %v324_v18 = vpop.eup %323 }
 0x1ac   :  { %v285_v20 = vsel %vm284_vm3, %v283_v19, %v324_v18  ;;  %v138_v21 = vrot.slane %v324_v18, 2 }
 0x1ae   :  { %308 = vmatmul.msk.f32.vlgmr.msrb.gmra.mxu0 %vm23_vm1, %v138_v21 }
 0x22b   :  { %v158_v22 = vpop.f32.mrf.mxu0 }
 0x22c   :  { %v162_v23 = vrot.slane %v158_v22, 5 }
 0x22e   :  { %v164_v24 = vadd.f32 %v162_v23, %v49_v7 }
 0x230   :  { %325 = vtanh.f32 %v164_v24 }
 0x236   :  { %v326_v25 = vpop.eup %325 }
 0x237   :  { %v287_v26 = vsel %vm286_vm4, %v285_v20, %v326_v25  ;;  %v167_v27 = vrot.slane %v326_v25, 3 }
 0x239   :  { %310 = vmatmul.msk.f32.vlgmr.msrb.gmra.mxu1 %vm23_vm1, %v167_v27 }
 0x2b6   :  { %v187_v28 = vpop.f32.mrf.mxu1 }
 0x2b7   :  { %v191_v29 = vrot.slane %v187_v28, 4 }
 0x2b9   :  { %v193_v30 = vadd.f32 %v191_v29, %v49_v7 }
 0x2bb   :  { %327 = vtanh.f32 %v193_v30 }
 0x2c1   :  { %v328_v31 = vpop.eup %327 }
 0x2c2   :  { %v288_v32 = vsel %vm27_vm0, %v287_v26, %v328_v31  ;;  %v196_v33 = vrot.slane %v328_v31, 4 }
 0x2c4   :  { %312 = vmatmul.msk.f32.vlgmr.msrb.gmra.mxu2 %vm23_vm1, %v196_v33 }
 0x347   :  { %v216_v34 = vpop.f32.mrf.mxu2 }
 0x348   :  { %v220_v35 = vrot.slane %v216_v34, 3 }
 0x34a   :  { %v222_v36 = vadd.f32 %v220_v35, %v49_v7 }
 0x34c   :  { %329 = vtanh.f32 %v222_v36 }
 0x352   :  { %v330_v37 = vpop.eup %329 }
 0x353   :  { %v290_v38 = vsel %vm289_vm5, %v288_v32, %v330_v37  ;;  %v225_v39 = vrot.slane %v330_v37, 5 }
 0x355   :  { %314 = vmatmul.msk.f32.vlgmr.msrb.gmra.mxu3 %vm23_vm1, %v225_v39 }
 0x3d8   :  { %v245_v40 = vpop.f32.mrf.mxu3 }
 0x3d9   :  { %v249_v41 = vrot.slane %v245_v40, 2 }
 0x3db   :  { %v251_v42 = vadd.f32 %v249_v41, %v49_v7 }
 0x3dd   :  { %331 = vtanh.f32 %v251_v42 }
 0x3e3   :  { %v332_v43 = vpop.eup %331 }
 0x3e4   :  { %v254_v44 = vrot.slane %v332_v43, 6  ;;  %v292_v45 = vsel %vm291_vm6, %v290_v38, %v332_v43 }
 0x3e6   :  { %316 = vmatmul.msk.f32.vlgmr.msra.gmra.mxu0 %vm23_vm1, %v254_v44 }
 0x463   :  { %v274_v46 = vpop.f32.mrf.mxu0 }
 0x464   :  { %v278_v47 = vrot.slane %v274_v46, 1 }
 0x466   :  { %v280_v48 = vadd.f32 %v278_v47, %v49_v7 }
 0x468   :  { %333 = vtanh.f32 %v280_v48 }
 0x46e   :  { %v334_v49 = vpop.eup %333 }
 0x46f   :  { %v294_v50 = vsel %vm293_vm7, %v292_v45, %v334_v49 }
 0x470   :  { %295 = vst.msk [vmem:[%s399_s4] sm:$0xff] %vm23_vm1, %v294_v50 }

</bundles_post_ra>
